<compile_context>
chip_gen: v7x
topology: tpu7x:2x2x1
jax: 0.10.0
libtpu: 0.0.40
codegen_flags: <defaults>
</compile_context>

<pallas_src>
import jax
import jax.numpy as jnp
from jax.experimental import pallas as pl
from jax.experimental.pallas import tpu as pltpu


def _autoencoder_kernel(x_ref,
                        w1_ref, b1_ref,
                        w2_ref, b2_ref,
                        w3_ref, b3_ref,
                        w4_ref, b4_ref,
                        o_ref):
    """Fused encoder+decoder forward pass for one batch tile (all in VMEM)."""
    x = x_ref[...]

    # encoder: Linear(input_dim, 10) + ReLU
    h1 = jnp.dot(x, w1_ref[...], preferred_element_type=jnp.float32) + b1_ref[...]
    h1 = jnp.maximum(h1, 0.0)

    # encoder: Linear(10, 3)
    z = jnp.dot(h1, w2_ref[...], preferred_element_type=jnp.float32) + b2_ref[...]

    # decoder: Linear(3, 10) + ReLU
    h2 = jnp.dot(z, w3_ref[...], preferred_element_type=jnp.float32) + b3_ref[...]
    h2 = jnp.maximum(h2, 0.0)

    # decoder: Linear(10, input_dim) + Sigmoid
    y = jnp.dot(h2, w4_ref[...], preferred_element_type=jnp.float32) + b4_ref[...]
    o_ref[...] = jax.nn.sigmoid(y).astype(o_ref.dtype)


def _choose_tile_b(batch, input_dim, itemsize, vmem_budget_bytes=40 << 20):
    """Pick the largest batch tile that fits a conservative VMEM budget.

    Per row we hold the x tile and the out tile, each double-buffered:
    4 * input_dim * itemsize bytes/row.  Weights are VMEM-resident once.
    Budget is sized for v7x's 64 MiB VMEM (works on v5e/v6e too); cap at
    1024 rows where the per-step overhead is already fully amortized.
    """
    weight_bytes = (2 * (input_dim * 10 + 10 * 3)) * 4 + (10 + 3 + 10 + input_dim) * 4
    budget = max(vmem_budget_bytes - weight_bytes, 1 << 20)
    per_row = 4 * input_dim * itemsize
    tile = budget // max(per_row, 1)
    tile = int(min(tile, batch, 1024))
    if tile >= batch:
        return batch                      # full extent -> no (8,128) constraint
    return max(8, (tile // 8) * 8)        # keep the sublane axis 8-aligned


def simple_autoencoder_forward(x, params, *, tile_b=None):
    """x: (batch, input_dim). params: dict of transposed weights/biases."""
    batch, input_dim = x.shape
    w1, b1 = params["w1"], params["b1"]   # (input_dim, 10), (1, 10)
    w2, b2 = params["w2"], params["b2"]   # (10, 3),         (1, 3)
    w3, b3 = params["w3"], params["b3"]   # (3, 10),         (1, 10)
    w4, b4 = params["w4"], params["b4"]   # (10, input_dim), (1, input_dim)

    if tile_b is None:
        tile_b = _choose_tile_b(batch, input_dim, x.dtype.itemsize)
    grid = (pl.cdiv(batch, tile_b),)

    # x / out march along the batch axis; weights stay resident (constant map).
    io_spec = pl.BlockSpec((tile_b, input_dim), lambda i: (i, 0))

    def resident(arr):
        return pl.BlockSpec(arr.shape, lambda i, _nd=arr.ndim: (0,) * _nd)

    flops = 2 * batch * (input_dim * 10 + 10 * 3 + 3 * 10 + 10 * input_dim)
    bytes_accessed = (
        2 * batch * input_dim * x.dtype.itemsize
        + sum(int(p.size) * p.dtype.itemsize
              for p in (w1, b1, w2, b2, w3, b3, w4, b4))
    )

    # NOTE: if input_dim is not a multiple of 128 the output store is masked
    # (vst.msk); for production sizes pad input_dim (and w4/b4 columns) to a
    # 128-multiple in the wrapper for a lane-dense store.
    return pl.pallas_call(
        _autoencoder_kernel,
        out_shape=jax.ShapeDtypeStruct((batch, input_dim), x.dtype),
        grid=grid,
        in_specs=[
            io_spec,
            resident(w1), resident(b1),
            resident(w2), resident(b2),
            resident(w3), resident(b3),
            resident(w4), resident(b4),
        ],
        out_specs=io_spec,
        compiler_params=pltpu.CompilerParams(
            dimension_semantics=("parallel",),      # megacore-shardable batch axis
            vmem_limit_bytes=48 << 20,              # safe on v7x's 64 MiB VMEM
        ),
        cost_estimate=pl.CostEstimate(
            flops=flops,
            transcendentals=batch * input_dim,      # sigmoid exp per output elem
            bytes_accessed=bytes_accessed,
        ),
    )(x, w1, b1, w2, b2, w3, b3, w4, b4)


def init_params(key, input_dim):
    """Deterministic parameter init matching the PyTorch layer shapes.

    PyTorch Linear stores weight as (out, in); we store the transpose (in, out)
    so the kernel computes x @ W + b directly.
    """
    def linear(key, fan_in, fan_out):
        kw, kb = jax.random.split(key)
        bound = 1.0 / jnp.sqrt(jnp.float32(fan_in))
        w = jax.random.uniform(kw, (fan_in, fan_out), jnp.float32, -bound, bound)
        b = jax.random.uniform(kb, (1, fan_out), jnp.float32, -bound, bound)
        return w, b

    k1, k2, k3, k4 = jax.random.split(key, 4)
    w1, b1 = linear(k1, input_dim, 10)
    w2, b2 = linear(k2, 10, 3)
    w3, b3 = linear(k3, 3, 10)
    w4, b4 = linear(k4, 10, input_dim)
    return {"w1": w1, "b1": b1, "w2": w2, "b2": b2,
            "w3": w3, "b3": b3, "w4": w4, "b4": b4}


def _reference_forward(x, p):
    """Pure-JAX reference (mirrors the PyTorch forward) for correctness check."""
    h = jnp.maximum(x @ p["w1"] + p["b1"], 0.0)
    z = h @ p["w2"] + p["b2"]
    h2 = jnp.maximum(z @ p["w3"] + p["b3"], 0.0)
    return jax.nn.sigmoid(h2 @ p["w4"] + p["b4"])


if __name__ == "__main__":
    key = jax.random.PRNGKey(0)
    k_param, k_x = jax.random.split(key)

    batch, input_dim = 64, 32
    params = init_params(k_param, input_dim)
    x = jax.random.uniform(k_x, (batch, input_dim), jnp.float32)

    ref = _reference_forward(x, params)

    # Multi-step grid path (exercises the pipelined batch tiling).
    out_tiled = simple_autoencoder_forward(x, params, tile_b=16)
    out_tiled = jax.block_until_ready(out_tiled)
    assert out_tiled.shape == (batch, input_dim)
    assert jnp.allclose(out_tiled, ref, atol=1e-5, rtol=1e-5)

    # Auto tile-size path (full batch fits in one block at this size).
    out_auto = simple_autoencoder_forward(x, params)
    out_auto = jax.block_until_ready(out_auto)
    assert jnp.allclose(out_auto, ref, atol=1e-5, rtol=1e-5)

    print("KERNEL_OK")
</pallas_src>

<mosaic_0001>
module attributes {stable_mosaic.version = 11 : i64} {
  func.func @_autoencoder_kernel(%arg0: i32, %arg1: memref<16x32xf32, #tpu.memory_space<vmem>>, %arg2: memref<32x10xf32, #tpu.memory_space<vmem>>, %arg3: memref<1x10xf32, #tpu.memory_space<vmem>>, %arg4: memref<10x3xf32, #tpu.memory_space<vmem>>, %arg5: memref<1x3xf32, #tpu.memory_space<vmem>>, %arg6: memref<3x10xf32, #tpu.memory_space<vmem>>, %arg7: memref<1x10xf32, #tpu.memory_space<vmem>>, %arg8: memref<10x32xf32, #tpu.memory_space<vmem>>, %arg9: memref<1x32xf32, #tpu.memory_space<vmem>>, %arg10: memref<16x32xf32, #tpu.memory_space<vmem>>) attributes {dimension_semantics = [#tpu.dimension_semantics<parallel>], iteration_bounds = array<i64: 4>, scalar_prefetch = 0 : i64, scratch_operands = 0 : i64, tpu.core_type = #tpu.core_type<tc>, window_params = [{transform_indices = @transform_0, window_bounds = array<i64: 16, 32>}, {pipeline_mode = #tpu.pipeline_mode<synchronous>, transform_indices = @transform_1, window_bounds = array<i64: 32, 10>}, {pipeline_mode = #tpu.pipeline_mode<synchronous>, transform_indices = @transform_2, window_bounds = array<i64: 1, 10>}, {pipeline_mode = #tpu.pipeline_mode<synchronous>, transform_indices = @transform_3, window_bounds = array<i64: 10, 3>}, {pipeline_mode = #tpu.pipeline_mode<synchronous>, transform_indices = @transform_4, window_bounds = array<i64: 1, 3>}, {pipeline_mode = #tpu.pipeline_mode<synchronous>, transform_indices = @transform_5, window_bounds = array<i64: 3, 10>}, {pipeline_mode = #tpu.pipeline_mode<synchronous>, transform_indices = @transform_6, window_bounds = array<i64: 1, 10>}, {pipeline_mode = #tpu.pipeline_mode<synchronous>, transform_indices = @transform_7, window_bounds = array<i64: 10, 32>}, {pipeline_mode = #tpu.pipeline_mode<synchronous>, transform_indices = @transform_8, window_bounds = array<i64: 1, 32>}, {transform_indices = @transform_9, window_bounds = array<i64: 16, 32>}]} {
    %c0 = arith.constant 0 : index
    %c0_0 = arith.constant 0 : index
    %0 = vector.load %arg1[%c0, %c0_0] : memref<16x32xf32, #tpu.memory_space<vmem>>, vector<16x32xf32>
    %c0_1 = arith.constant 0 : index
    %c0_2 = arith.constant 0 : index
    %1 = vector.load %arg2[%c0_1, %c0_2] : memref<32x10xf32, #tpu.memory_space<vmem>>, vector<32x10xf32>
    %cst = arith.constant dense<0.000000e+00> : vector<16x10xf32>
    %2 = tpu.matmul %0, %1, %cst {dimension_numbers = #tpu.dot_dimension_numbers<[1], [0], [0], [1], [0, 0, 1, 1], [], []>} : vector<16x32xf32>, vector<32x10xf32>, vector<16x10xf32> -> vector<16x10xf32>
    %c0_3 = arith.constant 0 : index
    %c0_4 = arith.constant 0 : index
    %3 = vector.load %arg3[%c0_3, %c0_4] : memref<1x10xf32, #tpu.memory_space<vmem>>, vector<1x10xf32>
    %4 = vector.broadcast %3 : vector<1x10xf32> to vector<16x10xf32>
    %5 = arith.addf %2, %4 : vector<16x10xf32>
    %cst_5 = arith.constant 0.000000e+00 : f32
    %6 = vector.broadcast %cst_5 : f32 to vector<16x10xf32>
    %7 = arith.maximumf %5, %6 : vector<16x10xf32>
    %c0_6 = arith.constant 0 : index
    %c0_7 = arith.constant 0 : index
    %8 = vector.load %arg4[%c0_6, %c0_7] : memref<10x3xf32, #tpu.memory_space<vmem>>, vector<10x3xf32>
    %cst_8 = arith.constant dense<0.000000e+00> : vector<16x3xf32>
    %9 = tpu.matmul %7, %8, %cst_8 {dimension_numbers = #tpu.dot_dimension_numbers<[1], [0], [0], [1], [0, 0, 1, 1], [], []>} : vector<16x10xf32>, vector<10x3xf32>, vector<16x3xf32> -> vector<16x3xf32>
    %c0_9 = arith.constant 0 : index
    %c0_10 = arith.constant 0 : index
    %10 = vector.load %arg5[%c0_9, %c0_10] : memref<1x3xf32, #tpu.memory_space<vmem>>, vector<1x3xf32>
    %11 = vector.broadcast %10 : vector<1x3xf32> to vector<16x3xf32>
    %12 = arith.addf %9, %11 : vector<16x3xf32>
    %c0_11 = arith.constant 0 : index
    %c0_12 = arith.constant 0 : index
    %13 = vector.load %arg6[%c0_11, %c0_12] : memref<3x10xf32, #tpu.memory_space<vmem>>, vector<3x10xf32>
    %cst_13 = arith.constant dense<0.000000e+00> : vector<16x10xf32>
    %14 = tpu.matmul %12, %13, %cst_13 {dimension_numbers = #tpu.dot_dimension_numbers<[1], [0], [0], [1], [0, 0, 1, 1], [], []>} : vector<16x3xf32>, vector<3x10xf32>, vector<16x10xf32> -> vector<16x10xf32>
    %c0_14 = arith.constant 0 : index
    %c0_15 = arith.constant 0 : index
    %15 = vector.load %arg7[%c0_14, %c0_15] : memref<1x10xf32, #tpu.memory_space<vmem>>, vector<1x10xf32>
    %16 = vector.broadcast %15 : vector<1x10xf32> to vector<16x10xf32>
    %17 = arith.addf %14, %16 : vector<16x10xf32>
    %cst_16 = arith.constant 0.000000e+00 : f32
    %18 = vector.broadcast %cst_16 : f32 to vector<16x10xf32>
    %19 = arith.maximumf %17, %18 : vector<16x10xf32>
    %c0_17 = arith.constant 0 : index
    %c0_18 = arith.constant 0 : index
    %20 = vector.load %arg8[%c0_17, %c0_18] : memref<10x32xf32, #tpu.memory_space<vmem>>, vector<10x32xf32>
    %cst_19 = arith.constant dense<0.000000e+00> : vector<16x32xf32>
    %21 = tpu.matmul %19, %20, %cst_19 {dimension_numbers = #tpu.dot_dimension_numbers<[1], [0], [0], [1], [0, 0, 1, 1], [], []>} : vector<16x10xf32>, vector<10x32xf32>, vector<16x32xf32> -> vector<16x32xf32>
    %c0_20 = arith.constant 0 : index
    %c0_21 = arith.constant 0 : index
    %22 = vector.load %arg9[%c0_20, %c0_21] : memref<1x32xf32, #tpu.memory_space<vmem>>, vector<1x32xf32>
    %23 = vector.broadcast %22 : vector<1x32xf32> to vector<16x32xf32>
    %24 = arith.addf %21, %23 : vector<16x32xf32>
    %25 = arith.negf %24 : vector<16x32xf32>
    %26 = math.exp %25 : vector<16x32xf32>
    %cst_22 = arith.constant 1.000000e+00 : f32
    %27 = vector.broadcast %cst_22 : f32 to vector<16x32xf32>
    %28 = arith.addf %27, %26 : vector<16x32xf32>
    %29 = arith.divf %27, %28 : vector<16x32xf32>
    %c0_23 = arith.constant 0 : index
    %c0_24 = arith.constant 0 : index
    %30 = vector.load %arg10[%c0_23, %c0_24] : memref<16x32xf32, #tpu.memory_space<vmem>>, vector<16x32xf32>
    tpu.vector_store %arg10[%c0_23, %c0_24], %29 {strides = array<i32>} : memref<16x32xf32, #tpu.memory_space<vmem>>, vector<16x32xf32>,
    return
  }
  func.func @transform_0(%arg0: i32) -> (i32, i32) {
    %c0_i32 = arith.constant 0 : i32
    %c0_i32_0 = arith.constant 0 : i32
    return %arg0, %c0_i32 : i32, i32
  }
  func.func @transform_1(%arg0: i32) -> (i32, i32) {
    %c0_i32 = arith.constant 0 : i32
    %c0_i32_0 = arith.constant 0 : i32
    %c0_i32_1 = arith.constant 0 : i32
    return %c0_i32, %c0_i32_0 : i32, i32
  }
  func.func @transform_2(%arg0: i32) -> (i32, i32) {
    %c0_i32 = arith.constant 0 : i32
    %c0_i32_0 = arith.constant 0 : i32
    %c0_i32_1 = arith.constant 0 : i32
    return %c0_i32, %c0_i32_0 : i32, i32
  }
  func.func @transform_3(%arg0: i32) -> (i32, i32) {
    %c0_i32 = arith.constant 0 : i32
    %c0_i32_0 = arith.constant 0 : i32
    %c0_i32_1 = arith.constant 0 : i32
    return %c0_i32, %c0_i32_0 : i32, i32
  }
  func.func @transform_4(%arg0: i32) -> (i32, i32) {
    %c0_i32 = arith.constant 0 : i32
    %c0_i32_0 = arith.constant 0 : i32
    %c0_i32_1 = arith.constant 0 : i32
    return %c0_i32, %c0_i32_0 : i32, i32
  }
  func.func @transform_5(%arg0: i32) -> (i32, i32) {
    %c0_i32 = arith.constant 0 : i32
    %c0_i32_0 = arith.constant 0 : i32
    %c0_i32_1 = arith.constant 0 : i32
    return %c0_i32, %c0_i32_0 : i32, i32
  }
  func.func @transform_6(%arg0: i32) -> (i32, i32) {
    %c0_i32 = arith.constant 0 : i32
    %c0_i32_0 = arith.constant 0 : i32
    %c0_i32_1 = arith.constant 0 : i32
    return %c0_i32, %c0_i32_0 : i32, i32
  }
  func.func @transform_7(%arg0: i32) -> (i32, i32) {
    %c0_i32 = arith.constant 0 : i32
    %c0_i32_0 = arith.constant 0 : i32
    %c0_i32_1 = arith.constant 0 : i32
    return %c0_i32, %c0_i32_0 : i32, i32
  }
  func.func @transform_8(%arg0: i32) -> (i32, i32) {
    %c0_i32 = arith.constant 0 : i32
    %c0_i32_0 = arith.constant 0 : i32
    %c0_i32_1 = arith.constant 0 : i32
    return %c0_i32, %c0_i32_0 : i32, i32
  }
  func.func @transform_9(%arg0: i32) -> (i32, i32) {
    %c0_i32 = arith.constant 0 : i32
    %c0_i32_0 = arith.constant 0 : i32
    return %arg0, %c0_i32 : i32, i32
  }
}

</mosaic_0001>

<bundles_post_ra>
// kernel: tpu_custom_call.1
= control target key start
LH: loop header
LB: loop body
LE: loop exit
PB: predicated region body
PF: predicated region fallthrough
CT: control target
= control target key end

     0   :  { %s958_s30 = smov 0   ;;  %s1041_s0 = inlined_call_operand.vmem [shape: f32[64,32], index: 0, kind: input, shape index: {}]   ;;  %s1042_s1 = inlined_call_operand.vmem [shape: f32[32,10], index: 1, kind: input, shape index: {}]   ;;  %s1043_s2 = inlined_call_operand.vmem [shape: f32[1,10], index: 2, kind: input, shape index: {}]   ;;  %s1044_s3 = inlined_call_operand.vmem [shape: f32[10,3], index: 3, kind: input, shape index: {}]   ;;  %s1045_s4 = inlined_call_operand.vmem [shape: f32[1,3], index: 4, kind: input, shape index: {}]   ;;  %s1046_s5 = inlined_call_operand.vmem [shape: f32[3,10], index: 5, kind: input, shape index: {}]   ;;  %s1047_s6 = inlined_call_operand.vmem [shape: f32[1,10], index: 6, kind: input, shape index: {}]   ;;  %s1048_s7 = inlined_call_operand.vmem [shape: f32[10,32], index: 7, kind: input, shape index: {}]   ;;  %s1049_s8 = inlined_call_operand.vmem [shape: f32[1,32], index: 8, kind: input, shape index: {}]   ;;  %s1050_s9 = inlined_call_operand.vmem [shape: f32[64,32], index: 9, kind: output, shape index: {}]  }
   0x1 LB: > { %s787_s10 = sadd.s32 4294967295, %s905_s30   ;;  %p791_p0 = scmp.ge.s32.totalorder %s905_s30, 1  ;;  %s905_s30 = sphi %s958_s30, %s19_s30  }
   0x2   : > { %p288_p1 = scmp.lt.s32.totalorder %s905_s30, 5 }
   0x4   : > { %p289_p2 = pnand %p791_p0, %p288_p1 }
   0x5   : > { %v338_v0 = vld [vmem:[%s1042_s1] sm:$0xff] (!%p289_p2)  ;;  %v339_v1 = vld [vmem:[%s1042_s1 + $0x8] sm:$0xff] (!%p289_p2)  ;;  %v340_v2 = vld [vmem:[%s1042_s1 + $0x10] sm:$0xff] (!%p289_p2)  ;;  %s792_s17 = sshll.u32 (!%p289_p2), %s787_s10, 1  ;;  %vm349_vm0 = vcmask (!%p289_p2), 261120   ;;  %vm449_vm1 = vcmask (!%p289_p2), 1041408  }
   0x6   : > { %292 = sbr.rel (%p289_p2) target bundleno = 913 (0x391), region = 56  ;;  %v862_v3 = vpack.c.bf16 (!%p289_p2), %v339_v1, %v338_v0  ;;  %v341_v4 = vld [vmem:[%s1042_s1 + $0x18] sm:$0xff] (!%p289_p2)  ;;  %p325_p3 = scmp.lt.s32.totalorder (!%p289_p2), %s792_s17, 7  ;;  %v433_v8 = vld [vmem:[%s1044_s3] sm:$0xff] (!%p289_p2)  ;;  %v434_v9 = vld [vmem:[%s1044_s3 + $0x8] sm:$0x3] (!%p289_p2) }
   0x7   : > { %v866_v5 = vpack.c.bf16 (!%p289_p2), %v341_v4, %v340_v2  ;;  %v870_v10 = vpack.c.bf16 (!%p289_p2), %v434_v9, %v433_v8  ;;  %vm907_vm2 = vmmov (!%p289_p2), 1   ;;  %v796_v12 = vld [vmem:[%s1043_s2] ss:$0 sm:$0xff] (!%p289_p2)  ;;  %vm442_vm4 = vcmask (!%p289_p2), 80896   ;;  %v625_v26 = vld [vmem:[%s1048_s7 + $0x8] sm:$0x3] (!%p289_p2) }
   0x8   : > { %863 = vmatprep.subr.bf16.mxu0 (!%p289_p2), %v862_v3  ;;  %vm994_vm3 = vmpackc.low (!%p289_p2), %vm449_vm1, %vm907_vm2  ;;  %v528_v19 = vld [vmem:[%s1046_s5] sm:$0x7] (!%p289_p2)  ;;  %vm543_vm5 = vcmask (!%p289_p2), 1042432   ;;  %vm536_vm6 = vcmask (!%p289_p2), 23552  }
   0x9   : > { %865 = vmatpush3.bf16.msra.mxu0 (!%p289_p2), %v862_v3  ;;  %872 = vmatprep.subr.msk.bf16.mxu1 (!%p289_p2), %vm994_vm3, %v870_v10  ;;  %v799_v20 = vld [vmem:[%s1045_s4] ss:$0 sm:$0xff] (!%p289_p2) }
   0xa   : > { %867 = vmatprep.subr.bf16.mxu0 (!%p289_p2), %v866_v5  ;;  %875 = vmatpush3.bf16.msk.msra.mxu1 (!%p289_p2), %vm994_vm3, %v870_v10  ;;  %v624_v25 = vld [vmem:[%s1048_s7] sm:$0xff] (!%p289_p2) }
   0xb   : > { %850 = vmatprep.subr.msk.mxu1 (!%p289_p2), %vm543_vm5, %v528_v19  ;;  %v876_v27 = vpack.c.bf16 (!%p289_p2), %v625_v26, %v624_v25  ;;  %v803_v28 = vld [vmem:[%s1047_s6] ss:$0 sm:$0xff] (!%p289_p2) }
   0xc   : > { %v807_v35 = vld [vmem:[%s1049_s8] ss:$0 sm:$0xff] (!%p289_p2) }
   0xd   : > { %s1054_s17 = smov (!%p325_p3, %s792_s17), 7  ;;  %869 = vmatpush3.bf16.msra.mxu0 %v866_v5 }
   0xe   : > { %s793_s20 = sshll.u32 %s1054_s17, 3  ;;  %878 = vmatprep.subr.msk.bf16.mxu0 %vm994_vm3, %v876_v27 }
   0xf   : > { %s328_s23 = scalar_lea.vmem %s1041_s0, %s793_s20  ;;  %s334_s26 = scalar_lea.vmem %s1050_s9, %s793_s20 }
  0x10   : > { %v336_v6 = vld [vmem:[%s328_s23] sm:$0xff]  ;;  %v337_v7 = vld [vmem:[%s328_s23 + $0x8] sm:$0xff] }
  0x11   : > { %840 = vmatprep.mubr.msk.f32.mxu0 %vm349_vm0, %v336_v6 }
  0x12   : > { %841 = vmatmul.mubr.msk.f32.vlgmr.msra.gmra.mrb[0].mxu0 %vm349_vm0, %v337_v7 }
  0x13   : > { %881 = vmatpush3.bf16.msk.msra.mxu0 %vm994_vm3, %v876_v27 }
  0xe5   : > { %v842_v13 = vpop.f32.mrb[0].mxu0 }
  0xe6   : > { %v428_v14 = vadd.f32 %v842_v13, %v796_v12  ;;  %v422_v15 = vpop.f32.mrb[1].mxu0 }
  0xe7   : > { %v423_v16 = vadd.f32 %v796_v12, %v422_v15 }
  0xe8   : > { %v432_v18 = vmax.f32 %v428_v14, 0.0 }
  0xe9   : > { %v431_v17 = vmax.f32 %v423_v16, 0.0 }
  0xeb   : > { %847 = vmatprep.mubr.msk.f32.mxu1 %vm442_vm4, %v431_v17 }
  0xec   : > { %848 = vmatmul.mubr.msk.f32.vlgmr.msra.gmra.mrb[0].mxu1 %vm442_vm4, %v432_v18 }
  0xed   : > { %851 = vmatpush3.msk.msra.mxu1 %vm543_vm5, %v528_v19 }
 0x1bf   : > { %v849_v21 = vpop.f32.mrb[0].mxu1 }
 0x1c0   : > { %v519_v22 = vpop.f32.mrb[1].mxu1  ;;  %v525_v24 = vadd.f32 %v849_v21, %v799_v20 }
 0x1c1   : > { %v520_v23 = vadd.f32 %v799_v20, %v519_v22 }
 0x1c3   : > { %852 = vmatprep.mubr.msk.f32.mxu1 %vm536_vm6, %v520_v23 }
 0x1c4   : > { %853 = vmatmul.mubr.msk.f32.vlgmr.msra.gmra.mrb[2].mxu1 %vm536_vm6, %v525_v24 }
 0x297   : > { %v854_v29 = vpop.f32.mrb[2].mxu1 }
 0x298   : > { %v619_v30 = vadd.f32 %v854_v29, %v803_v28  ;;  %v613_v31 = vpop.f32.mrb[3].mxu1 }
 0x299   : > { %v614_v32 = vadd.f32 %v803_v28, %v613_v31 }
 0x29a   : > { %v623_v34 = vmax.f32 %v619_v30, 0.0 }
 0x29b   : > { %v622_v33 = vmax.f32 %v614_v32, 0.0 }
 0x29d   : > { %859 = vmatprep.mubr.msk.f32.mxu0 %vm442_vm4, %v622_v33 }
 0x29e   : > { %860 = vmatmul.mubr.msk.f32.vlgmr.msra.gmra.mrb[2].mxu0 %vm442_vm4, %v623_v34 }
 0x371   : > { %v861_v36 = vpop.f32.mrb[2].mxu0 }
 0x372   : > { %v714_v37 = vadd.f32 %v861_v36, %v807_v35  ;;  %v708_v38 = vpop.f32.mrb[3].mxu0 }
 0x373   : > { %v709_v39 = vadd.f32 %v807_v35, %v708_v38 }
 0x374   : > { %v812_v40 = vmul.f32 -1.442695, %v714_v37 }
 0x375   : > { %v811_v41 = vmul.f32 -1.442695, %v709_v39 }
 0x376   : > { %891 = vpow2.f32 %v812_v40 }
 0x377   : > { %893 = vpow2.f32 %v811_v41 }
 0x380   : > { %v892_v42 = vpop.eup %891 }
 0x381   : > { %v894_v43 = vpop.eup %893  ;;  %v724_v44 = vadd.f32 1.0, %v892_v42 }
 0x382   : > { %v723_v45 = vadd.f32 1.0, %v894_v43 }
 0x384   : > { %895 = vrcp.f32 %v723_v45 }
 0x385   : > { %897 = vrcp.f32 %v724_v44 }
 0x38e   : > { %v896_v46 = vpop.eup %895 }
 0x38f   : > { %v898_v47 = vpop.eup %897  ;;  %729 = vst.msk [vmem:[%s334_s26] sm:$0xff] %vm349_vm0, %v896_v46 }
 0x390   : > { %730 = vst.msk [vmem:[%s334_s26 + $0x8] sm:$0xff] %vm349_vm0, %v898_v47 }
 0x391 PF: > { %s19_s30 = sadd.s32 1, %s905_s30  }
 0x392   : > { %p16_p4 = scmp.ge.s32.totalorder %s19_s30, 6  }
 0x394   :  { %18 = sbr.rel (!%p16_p4) target bundleno = 1 (0x1), region = 86 }

</bundles_post_ra>
